<compile_context>
chip_gen: v6e
topology: v6e:2x2x1
jax: 0.10.0
libtpu: 0.0.40
codegen_flags: <defaults>
</compile_context>

<pallas_src>
import jax
import jax.numpy as jnp
from jax.experimental import pallas as pl
from jax.experimental.pallas import tpu as pltpu


# ----------------------------------------------------------------------------
# Kernels
# ----------------------------------------------------------------------------
def _mlp_resident_kernel(x_ref, w1_ref, b1_ref, w2_ref, b2_ref, o_ref):
    """Fused tanh-MLP for one row tile; w1/w2/biases are VMEM-resident."""
    # In-kernel bf16 cast: x crosses HBM exactly once, in its native dtype.
    x = x_ref[...].astype(w1_ref.dtype)
    h = jnp.dot(x, w1_ref[...], preferred_element_type=jnp.float32) + b1_ref[...]
    h = jnp.tanh(h)  # f32 bias-add + tanh on VPU/EUP; padded hidden cols stay 0
    out = jnp.dot(h.astype(w2_ref.dtype), w2_ref[...],
                  preferred_element_type=jnp.float32) + b2_ref[...]
    o_ref[...] = out.astype(o_ref.dtype)


def _mlp_ktiled_kernel(x_ref, w1_ref, b1_ref, w2_ref, b2_ref, o_ref, acc_ref):
    """Fallback: K-tiled first matmul with f32 accumulator (w1 too big for VMEM)."""
    k = pl.program_id(1)

    @pl.when(k == 0)
    def _():
        acc_ref[...] = jnp.zeros_like(acc_ref)

    acc_ref[...] += jnp.dot(x_ref[...].astype(w1_ref.dtype), w1_ref[...],
                            preferred_element_type=jnp.float32)

    @pl.when(k == pl.num_programs(1) - 1)
    def _():
        h = jnp.tanh(acc_ref[...] + b1_ref[...])
        out = jnp.dot(h.astype(w2_ref.dtype), w2_ref[...],
                      preferred_element_type=jnp.float32) + b2_ref[...]
        o_ref[...] = out.astype(o_ref.dtype)


# ----------------------------------------------------------------------------
# Parameter preparation (run ONCE, hoisted out of the per-forward path)
# ----------------------------------------------------------------------------
def _round_up(a, m):
    return (a + m - 1) // m * m


def _vmem_capacity_bytes():
    try:
        info = pltpu.get_tpu_info()
        cap = getattr(info, "vmem_capacity_bytes", None)
        if cap:
            return int(cap)
    except Exception:
        pass
    return 64 << 20  # conservative (v7x per-TC physical VMEM)


def prepare_naive_mlp_params(w1, b1, w2, b2):
    """Pad + cast weights once; decide tiling strategy from the VMEM budget.

    Weights are stored (in_features, out_features) — the transpose of PyTorch's
    (out, in) Linear layout — so the kernel computes x @ W + b directly.
    """
    D, H = w1.shape
    Hw2, O = w2.shape
    assert Hw2 == H
    h_pad = _round_up(H, 128)   # lane-dense hidden
    o_pad = _round_up(O, 128)   # lane-dense output (unmasked vst)

    vmem_cap = _vmem_capacity_bytes()
    vmem_limit = min(vmem_cap * 7 // 8, 112 << 20)   # ~112 MiB v5e/v6e, ~56 MiB v7x
    budget = max(vmem_limit - (6 << 20), 8 << 20)    # headroom for compiler scratch

    cdt = jnp.bfloat16
    x_b = 4    # activations streamed natively (f32 here)
    out_b = 4

    # --- Preferred: w1 fully VMEM-resident, no K grid axis, no w1 re-streaming.
    d_res = _round_up(D, 128)
    fixed_res = d_res * h_pad * 2 + h_pad * o_pad * 2 + (h_pad + o_pad) * 4
    per_row_res = (2 * d_res * x_b          # double-buffered x tile
                   + 2 * o_pad * out_b      # double-buffered out tile
                   + h_pad * 4 + h_pad * 2  # f32 hidden + bf16 hidden temps
                   + o_pad * 4)             # f32 out temp
    tm_fit = (budget - fixed_res) // per_row_res if budget > fixed_res else 0
    tm_fit = (int(tm_fit) // 8) * 8

    if tm_fit >= 8:
        mode = "resident"
        d_pad = d_res
        tk = d_pad
        tm_cap = min(tm_fit, 1024)
    else:
        # --- Fallback: K-tiled accumulation; maximize tm within budget, then tk.
        mode = "ktiled"
        tm_cap = 256
        fixed_kt = (h_pad * o_pad * 2 + (h_pad + o_pad) * 4   # w2 + biases
                    + tm_cap * h_pad * 4                      # f32 accumulator
                    + 2 * tm_cap * o_pad * out_b              # out tile (double-buffered)
                    + tm_cap * (h_pad * 2 + o_pad * 4))       # temps
        denom = 2 * (tm_cap * x_b + h_pad * 2)                # 2x-buffered x tile + w1 slab
        tk = ((budget - fixed_kt) // denom) // 128 * 128 if budget > fixed_kt else 128
        tk = max(128, int(tk))
        d_base = _round_up(D, 128)
        tk = min(tk, d_base)
        k_steps = -(-d_base // tk)
        tk = _round_up(-(-d_base // k_steps), 128)   # balance K tiles: waste < 128 cols
        d_pad = k_steps * tk

    # Zero-pad + bf16-cast parameters (padding is mathematically inert: padded
    # hidden cols get bias 0 -> tanh(0)=0 -> hit zero w2 rows).
    w1p = jnp.pad(w1.astype(cdt), ((0, d_pad - D), (0, h_pad - H)))
    b1p = jnp.pad(b1.reshape(1, -1).astype(jnp.float32), ((0, 0), (0, h_pad - H)))
    w2p = jnp.pad(w2.astype(cdt), ((0, h_pad - H), (0, o_pad - O)))
    b2p = jnp.pad(b2.reshape(1, -1).astype(jnp.float32), ((0, 0), (0, o_pad - O)))

    return dict(mode=mode, w1=w1p, b1=b1p, w2=w2p, b2=b2p,
                D=D, H=H, O=O, d_pad=d_pad, h_pad=h_pad, o_pad=o_pad,
                tk=tk, tm_cap=tm_cap, vmem_limit=int(vmem_limit))


# ----------------------------------------------------------------------------
# Forward
# ----------------------------------------------------------------------------
def naive_mlp_pallas(x_flat, prep):
    """x_flat: (N, D) activations; prep: output of prepare_naive_mlp_params."""
    N, D = x_flat.shape
    assert D == prep["D"], "input feature dim mismatch with prepared params"
    out_dtype = x_flat.dtype
    d_pad, h_pad, o_pad = prep["d_pad"], prep["h_pad"], prep["o_pad"]
    O = prep["O"]
    tm_cap = prep["tm_cap"]

    # Row tiling: balance tiles so padding waste stays < one sublane group, and
    # keep >= 2 row tiles when feasible so v7x's two TensorCores both engage.
    n_tiles = max(1, -(-N // tm_cap))
    if n_tiles == 1 and N >= 16:
        n_tiles = 2
    tm = _round_up(-(-N // n_tiles), 8)
    n_pad = n_tiles * tm

    # Pad rows / K lanes only; x keeps its native dtype (bf16 cast is in-kernel).
    if n_pad != N or d_pad != D:
        xp = jnp.pad(x_flat, ((0, n_pad - N), (0, d_pad - D)))
    else:
        xp = x_flat

    w1p, b1p, w2p, b2p = prep["w1"], prep["b1"], prep["w2"], prep["b2"]
    x_bytes = xp.dtype.itemsize
    o_bytes = jnp.dtype(out_dtype).itemsize

    def run(optimized):
        if prep["mode"] == "resident":
            def cspec(shape):
                if optimized:
                    return pl.BlockSpec(shape, lambda i: (0, 0),
                                        pipeline_mode=pl.Buffered(1))
                return pl.BlockSpec(shape, lambda i: (0, 0))

            cost = None
            if optimized:
                cost = pl.CostEstimate(
                    flops=2 * n_pad * d_pad * h_pad + 2 * n_pad * h_pad * o_pad,
                    transcendentals=n_pad * h_pad,
                    bytes_accessed=int(n_pad * d_pad * x_bytes
                                       + d_pad * h_pad * 2 + h_pad * o_pad * 2
                                       + (h_pad + o_pad) * 4
                                       + n_pad * o_pad * o_bytes))
            return pl.pallas_call(
                _mlp_resident_kernel,
                out_shape=jax.ShapeDtypeStruct((n_pad, o_pad), out_dtype),
                grid_spec=pltpu.PrefetchScalarGridSpec(
                    num_scalar_prefetch=0,
                    grid=(n_tiles,),
                    in_specs=[
                        pl.BlockSpec((tm, d_pad), lambda i: (i, 0)),  # x streams
                        cspec((d_pad, h_pad)),                        # w1 resident
                        cspec((1, h_pad)),                            # b1 resident
                        cspec((h_pad, o_pad)),                        # w2 resident
                        cspec((1, o_pad)),                            # b2 resident
                    ],
                    out_specs=pl.BlockSpec((tm, o_pad), lambda i: (i, 0)),
                ),
                compiler_params=pltpu.CompilerParams(
                    dimension_semantics=("parallel",),
                    vmem_limit_bytes=prep["vmem_limit"],
                ),
                cost_estimate=cost,
            )(xp, w1p, b1p, w2p, b2p)

        # -------- K-tiled fallback (w1 too large for VMEM residency) --------
        tk = prep["tk"]
        k_steps = d_pad // tk

        def cspec(shape):
            if optimized:
                return pl.BlockSpec(shape, lambda i, k: (0, 0),
                                    pipeline_mode=pl.Buffered(1))
            return pl.BlockSpec(shape, lambda i, k: (0, 0))

        cost = None
        if optimized:
            cost = pl.CostEstimate(
                flops=2 * n_pad * d_pad * h_pad + 2 * n_pad * h_pad * o_pad,
                transcendentals=n_pad * h_pad,
                bytes_accessed=int(n_pad * d_pad * x_bytes
                                   + n_tiles * d_pad * h_pad * 2   # w1 re-streamed/row tile
                                   + h_pad * o_pad * 2 + (h_pad + o_pad) * 4
                                   + n_pad * o_pad * o_bytes))
        return pl.pallas_call(
            _mlp_ktiled_kernel,
            out_shape=jax.ShapeDtypeStruct((n_pad, o_pad), out_dtype),
            grid_spec=pltpu.PrefetchScalarGridSpec(
                num_scalar_prefetch=0,
                grid=(n_tiles, k_steps),
                in_specs=[
                    pl.BlockSpec((tm, tk), lambda i, k: (i, k)),      # x tile
                    pl.BlockSpec((tk, h_pad), lambda i, k: (k, 0)),   # w1 k-slab
                    cspec((1, h_pad)),                                # b1 resident
                    cspec((h_pad, o_pad)),                            # w2 resident
                    cspec((1, o_pad)),                                # b2 resident
                ],
                out_specs=pl.BlockSpec((tm, o_pad), lambda i, k: (i, 0)),
                scratch_shapes=[pltpu.VMEM((tm, h_pad), jnp.float32)],
            ),
            compiler_params=pltpu.CompilerParams(
                dimension_semantics=("parallel", "arbitrary"),
                vmem_limit_bytes=prep["vmem_limit"],
            ),
            cost_estimate=cost,
        )(xp, w1p, b1p, w2p, b2p)

    try:
        # Optimistic variant (single-buffered residents + CostEstimate); block so
        # any lowering/runtime issue surfaces here and triggers the fallback.
        out_padded = jax.block_until_ready(run(optimized=True))
    except Exception:
        out_padded = run(optimized=False)

    return out_padded[:N, :O]


def naive_mlp_forward(x_list, prep):
    """Mirrors NaiveMLP.forward: takes a 1-element list, returns a 1-element list."""
    assert len(x_list) == 1
    x = x_list[0]
    n = x.shape[0]
    x_flat = x.reshape(n, -1)          # == torch x.view(x.size(0), -1)
    return [naive_mlp_pallas(x_flat, prep)]
    # TODO(synk): multi-hidden-layer variant (hid_channels as a list) would chain
    # additional resident matmul+tanh stages in the same kernel body.


def _init_params(key, in_channels, hid_channels, out_channels, dtype=jnp.float32):
    """Deterministic synthetic init (normal, std=0.02; zero bias).

    Weights are created directly in (in_features, out_features) layout — the
    transpose of PyTorch Linear's (out, in) — which is what the kernel expects.
    """
    k1, k2 = jax.random.split(key)
    w1 = (0.02 * jax.random.normal(k1, (in_channels, hid_channels))).astype(dtype)
    b1 = jnp.zeros((1, hid_channels), dtype)
    w2 = (0.02 * jax.random.normal(k2, (hid_channels, out_channels))).astype(dtype)
    b2 = jnp.zeros((1, out_channels), dtype)
    return w1, b1, w2, b2


if __name__ == "__main__":
    # Small shapes consistent with the module: NCHW feature map flattened.
    N, C, Hsp, Wsp = 2, 4, 16, 16
    in_channels = C * Hsp * Wsp        # 1024 after view(N, -1)
    hid_channels = 32
    out_channels = 16

    key = jax.random.PRNGKey(0)
    kx, kp = jax.random.split(key)
    x = jax.random.normal(kx, (N, C, Hsp, Wsp), dtype=jnp.float32)
    params = _init_params(kp, in_channels, hid_channels, out_channels)

    # One-time parameter preparation (pad + bf16 cast + tiling decisions).
    prep = prepare_naive_mlp_params(*params)

    out = naive_mlp_forward([x], prep)[0]
    out = jax.block_until_ready(out)

    # Pure-JAX reference using the same bf16-operand / f32-accumulate pipeline.
    w1, b1, w2, b2 = params
    x_flat = x.reshape(N, -1)
    bf = jnp.bfloat16
    h_ref = jnp.tanh(jnp.dot(x_flat.astype(bf), w1.astype(bf),
                             preferred_element_type=jnp.float32) + b1)
    ref = jnp.dot(h_ref.astype(bf), w2.astype(bf),
                  preferred_element_type=jnp.float32) + b2

    assert out.shape == (N, out_channels)
    assert jnp.allclose(out, ref.astype(out.dtype), atol=1e-3, rtol=1e-2), \
        "mismatch vs reference"

    print("KERNEL_OK")
</pallas_src>

<mosaic_0001>
module attributes {stable_mosaic.version = 11 : i64} {
  func.func @_mlp_resident_kernel(%arg0: i32, %arg1: memref<8x1024xf32, #tpu.memory_space<vmem>>, %arg2: memref<1024x128xbf16, #tpu.memory_space<vmem>>, %arg3: memref<1x128xf32, #tpu.memory_space<vmem>>, %arg4: memref<128x128xbf16, #tpu.memory_space<vmem>>, %arg5: memref<1x128xf32, #tpu.memory_space<vmem>>, %arg6: memref<8x128xf32, #tpu.memory_space<vmem>>) attributes {dimension_semantics = [#tpu.dimension_semantics<parallel>], iteration_bounds = array<i64: 1>, scalar_prefetch = 0 : i64, scratch_operands = 0 : i64, tpu.core_type = #tpu.core_type<tc>, window_params = [{transform_indices = @transform_0, window_bounds = array<i64: 8, 1024>}, {pipeline_mode = #tpu.pipeline_mode<synchronous>, transform_indices = @transform_1, window_bounds = array<i64: 1024, 128>}, {pipeline_mode = #tpu.pipeline_mode<synchronous>, transform_indices = @transform_2, window_bounds = array<i64: 1, 128>}, {pipeline_mode = #tpu.pipeline_mode<synchronous>, transform_indices = @transform_3, window_bounds = array<i64: 128, 128>}, {pipeline_mode = #tpu.pipeline_mode<synchronous>, transform_indices = @transform_4, window_bounds = array<i64: 1, 128>}, {transform_indices = @transform_5, window_bounds = array<i64: 8, 128>}]} {
    %c0 = arith.constant 0 : index
    %c0_0 = arith.constant 0 : index
    %0 = vector.load %arg1[%c0, %c0_0] : memref<8x1024xf32, #tpu.memory_space<vmem>>, vector<8x1024xf32>
    %1 = arith.truncf %0 : vector<8x1024xf32> to vector<8x1024xbf16>
    %c0_1 = arith.constant 0 : index
    %c0_2 = arith.constant 0 : index
    %2 = vector.load %arg2[%c0_1, %c0_2] : memref<1024x128xbf16, #tpu.memory_space<vmem>>, vector<1024x128xbf16>
    %cst = arith.constant dense<0.000000e+00> : vector<8x128xf32>
    %3 = tpu.matmul %1, %2, %cst {dimension_numbers = #tpu.dot_dimension_numbers<[1], [0], [0], [1], [0, 0, 1, 1], [], []>} : vector<8x1024xbf16>, vector<1024x128xbf16>, vector<8x128xf32> -> vector<8x128xf32>
    %c0_3 = arith.constant 0 : index
    %c0_4 = arith.constant 0 : index
    %4 = vector.load %arg3[%c0_3, %c0_4] : memref<1x128xf32, #tpu.memory_space<vmem>>, vector<1x128xf32>
    %5 = vector.broadcast %4 : vector<1x128xf32> to vector<8x128xf32>
    %6 = arith.addf %3, %5 : vector<8x128xf32>
    %7 = math.tanh %6 : vector<8x128xf32>
    %8 = arith.truncf %7 : vector<8x128xf32> to vector<8x128xbf16>
    %c0_5 = arith.constant 0 : index
    %c0_6 = arith.constant 0 : index
    %9 = vector.load %arg4[%c0_5, %c0_6] : memref<128x128xbf16, #tpu.memory_space<vmem>>, vector<128x128xbf16>
    %cst_7 = arith.constant dense<0.000000e+00> : vector<8x128xf32>
    %10 = tpu.matmul %8, %9, %cst_7 {dimension_numbers = #tpu.dot_dimension_numbers<[1], [0], [0], [1], [0, 0, 1, 1], [], []>} : vector<8x128xbf16>, vector<128x128xbf16>, vector<8x128xf32> -> vector<8x128xf32>
    %c0_8 = arith.constant 0 : index
    %c0_9 = arith.constant 0 : index
    %11 = vector.load %arg5[%c0_8, %c0_9] : memref<1x128xf32, #tpu.memory_space<vmem>>, vector<1x128xf32>
    %12 = vector.broadcast %11 : vector<1x128xf32> to vector<8x128xf32>
    %13 = arith.addf %10, %12 : vector<8x128xf32>
    %c0_10 = arith.constant 0 : index
    %c0_11 = arith.constant 0 : index
    %14 = vector.load %arg6[%c0_10, %c0_11] : memref<8x128xf32, #tpu.memory_space<vmem>>, vector<8x128xf32>
    tpu.vector_store %arg6[%c0_10, %c0_11], %13 {strides = array<i32>} : memref<8x128xf32, #tpu.memory_space<vmem>>, vector<8x128xf32>,
    return
  }
  func.func @transform_0(%arg0: i32) -> (i32, i32) {
    %c0_i32 = arith.constant 0 : i32
    %c0_i32_0 = arith.constant 0 : i32
    return %arg0, %c0_i32 : i32, i32
  }
  func.func @transform_1(%arg0: i32) -> (i32, i32) {
    %c0_i32 = arith.constant 0 : i32
    %c0_i32_0 = arith.constant 0 : i32
    %c0_i32_1 = arith.constant 0 : i32
    return %c0_i32, %c0_i32_0 : i32, i32
  }
  func.func @transform_2(%arg0: i32) -> (i32, i32) {
    %c0_i32 = arith.constant 0 : i32
    %c0_i32_0 = arith.constant 0 : i32
    %c0_i32_1 = arith.constant 0 : i32
    return %c0_i32, %c0_i32_0 : i32, i32
  }
  func.func @transform_3(%arg0: i32) -> (i32, i32) {
    %c0_i32 = arith.constant 0 : i32
    %c0_i32_0 = arith.constant 0 : i32
    %c0_i32_1 = arith.constant 0 : i32
    return %c0_i32, %c0_i32_0 : i32, i32
  }
  func.func @transform_4(%arg0: i32) -> (i32, i32) {
    %c0_i32 = arith.constant 0 : i32
    %c0_i32_0 = arith.constant 0 : i32
    %c0_i32_1 = arith.constant 0 : i32
    return %c0_i32, %c0_i32_0 : i32, i32
  }
  func.func @transform_5(%arg0: i32) -> (i32, i32) {
    %c0_i32 = arith.constant 0 : i32
    %c0_i32_0 = arith.constant 0 : i32
    return %arg0, %c0_i32 : i32, i32
  }
}

module attributes {stable_mosaic.version = 11 : i64} {
  func.func @_mlp_resident_kernel(%arg0: i32, %arg1: memref<8x1024xf32, #tpu.memory_space<vmem>>, %arg2: memref<1024x128xbf16, #tpu.memory_space<vmem>>, %arg3: memref<1x128xf32, #tpu.memory_space<vmem>>, %arg4: memref<128x128xbf16, #tpu.memory_space<vmem>>, %arg5: memref<1x128xf32, #tpu.memory_space<vmem>>, %arg6: memref<8x128xf32, #tpu.memory_space<vmem>>) attributes {dimension_semantics = [#tpu.dimension_semantics<parallel>], iteration_bounds = array<i64: 1>, scalar_prefetch = 0 : i64, scratch_operands = 0 : i64, tpu.core_type = #tpu.core_type<tc>, window_params = [{transform_indices = @transform_0, window_bounds = array<i64: 8, 1024>}, {pipeline_mode = #tpu.pipeline_mode<synchronous>, transform_indices = @transform_1, window_bounds = array<i64: 1024, 128>}, {pipeline_mode = #tpu.pipeline_mode<synchronous>, transform_indices = @transform_2, window_bounds = array<i64: 1, 128>}, {pipeline_mode = #tpu.pipeline_mode<synchronous>, transform_indices = @transform_3, window_bounds = array<i64: 128, 128>}, {pipeline_mode = #tpu.pipeline_mode<synchronous>, transform_indices = @transform_4, window_bounds = array<i64: 1, 128>}, {transform_indices = @transform_5, window_bounds = array<i64: 8, 128>}]} {
    %c0 = arith.constant 0 : index
    %c0_0 = arith.constant 0 : index
    %0 = vector.load %arg1[%c0, %c0_0] : memref<8x1024xf32, #tpu.memory_space<vmem>>, vector<8x1024xf32>
    %1 = arith.truncf %0 : vector<8x1024xf32> to vector<8x1024xbf16>
    %c0_1 = arith.constant 0 : index
    %c0_2 = arith.constant 0 : index
    %2 = vector.load %arg2[%c0_1, %c0_2] : memref<1024x128xbf16, #tpu.memory_space<vmem>>, vector<1024x128xbf16>
    %cst = arith.constant dense<0.000000e+00> : vector<8x128xf32>
    %3 = tpu.matmul %1, %2, %cst {dimension_numbers = #tpu.dot_dimension_numbers<[1], [0], [0], [1], [0, 0, 1, 1], [], []>} : vector<8x1024xbf16>, vector<1024x128xbf16>, vector<8x128xf32> -> vector<8x128xf32>
    %c0_3 = arith.constant 0 : index
    %c0_4 = arith.constant 0 : index
    %4 = vector.load %arg3[%c0_3, %c0_4] : memref<1x128xf32, #tpu.memory_space<vmem>>, vector<1x128xf32>
    %5 = vector.broadcast %4 : vector<1x128xf32> to vector<8x128xf32>
    %6 = arith.addf %3, %5 : vector<8x128xf32>
    %7 = math.tanh %6 : vector<8x128xf32>
    %8 = arith.truncf %7 : vector<8x128xf32> to vector<8x128xbf16>
    %c0_5 = arith.constant 0 : index
    %c0_6 = arith.constant 0 : index
    %9 = vector.load %arg4[%c0_5, %c0_6] : memref<128x128xbf16, #tpu.memory_space<vmem>>, vector<128x128xbf16>
    %cst_7 = arith.constant dense<0.000000e+00> : vector<8x128xf32>
    %10 = tpu.matmul %8, %9, %cst_7 {dimension_numbers = #tpu.dot_dimension_numbers<[1], [0], [0], [1], [0, 0, 1, 1], [], []>} : vector<8x128xbf16>, vector<128x128xbf16>, vector<8x128xf32> -> vector<8x128xf32>
    %c0_8 = arith.constant 0 : index
    %c0_9 = arith.constant 0 : index
    %11 = vector.load %arg5[%c0_8, %c0_9] : memref<1x128xf32, #tpu.memory_space<vmem>>, vector<1x128xf32>
    %12 = vector.broadcast %11 : vector<1x128xf32> to vector<8x128xf32>
    %13 = arith.addf %10, %12 : vector<8x128xf32>
    %c0_10 = arith.constant 0 : index
    %c0_11 = arith.constant 0 : index
    %14 = vector.load %arg6[%c0_10, %c0_11] : memref<8x128xf32, #tpu.memory_space<vmem>>, vector<8x128xf32>
    tpu.vector_store %arg6[%c0_10, %c0_11], %13 {strides = array<i32>} : memref<8x128xf32, #tpu.memory_space<vmem>>, vector<8x128xf32>,
    return
  }
  func.func @transform_0(%arg0: i32) -> (i32, i32) {
    %c0_i32 = arith.constant 0 : i32
    %c0_i32_0 = arith.constant 0 : i32
    return %arg0, %c0_i32 : i32, i32
  }
  func.func @transform_1(%arg0: i32) -> (i32, i32) {
    %c0_i32 = arith.constant 0 : i32
    %c0_i32_0 = arith.constant 0 : i32
    %c0_i32_1 = arith.constant 0 : i32
    return %c0_i32, %c0_i32_0 : i32, i32
  }
  func.func @transform_2(%arg0: i32) -> (i32, i32) {
    %c0_i32 = arith.constant 0 : i32
    %c0_i32_0 = arith.constant 0 : i32
    %c0_i32_1 = arith.constant 0 : i32
    return %c0_i32, %c0_i32_0 : i32, i32
  }
  func.func @transform_3(%arg0: i32) -> (i32, i32) {
    %c0_i32 = arith.constant 0 : i32
    %c0_i32_0 = arith.constant 0 : i32
    %c0_i32_1 = arith.constant 0 : i32
    return %c0_i32, %c0_i32_0 : i32, i32
  }
  func.func @transform_4(%arg0: i32) -> (i32, i32) {
    %c0_i32 = arith.constant 0 : i32
    %c0_i32_0 = arith.constant 0 : i32
    %c0_i32_1 = arith.constant 0 : i32
    return %c0_i32, %c0_i32_0 : i32, i32
  }
  func.func @transform_5(%arg0: i32) -> (i32, i32) {
    %c0_i32 = arith.constant 0 : i32
    %c0_i32_0 = arith.constant 0 : i32
    return %arg0, %c0_i32 : i32, i32
  }
}

</mosaic_0001>

<bundles_post_ra>
// kernel: tpu_custom_call.1
= control target key start
LH: loop header
LB: loop body
LE: loop exit
PB: predicated region body
PF: predicated region fallthrough
CT: control target
= control target key end

     0   :  { %10 = vsyncpa [#allocation3], 0  ;;  %s1301_s0 = inlined_call_operand.hbm [shape: f32[8,1024], index: 0, kind: input, shape index: {}]   ;;  %s1302_s1 = inlined_call_operand.hbm [shape: bf16[1024,128], index: 1, kind: input, shape index: {}]   ;;  %s1303_s2 = inlined_call_operand.vmem [shape: f32[1,128], index: 2, kind: input, shape index: {}]   ;;  %s1304_s3 = inlined_call_operand.hbm [shape: bf16[128,128], index: 3, kind: input, shape index: {}]   ;;  %s1305_s4 = inlined_call_operand.vmem [shape: f32[1,128], index: 4, kind: input, shape index: {}]   ;;  %s1306_s5 = inlined_call_operand.hbm [shape: f32[8,128], index: 5, kind: output, shape index: {}]  }
   0x1   :  { %11 = vsyncpa [#allocation6], 0 }
   0x2   :  { %12 = vsyncpa [#allocation4], 0  ;;  %s1245_s18 = smov [#allocation5]  }
   0x3   :  { %s28_s19 = sshll.u32 %s1245_s18, 4  ;;  %s29_s19 = int_to_ptr.vmem [resolvable:$true] %s28_s19 }
   0x4   :  { %s1167_s20 = scalar_lea.vmem %s29_s19, 8192  ;;  %p1172_p1 = scmp.lt.s32.totalorder %s29_s19, %s29_s19 }
   0x5   :  { %p1168_p0 = scmp.ne.s32.totalorder %s29_s19, %s1167_s20  ;;  %p1173_p2 = scmp.lt.s32.totalorder %s1167_s20, %s1167_s20 }
   0x7   :  { %p1174_p3 = por %p1173_p2, %p1172_p1 }
   0x9   :  { %p1175_p4 = pnand %p1174_p3, %p1168_p0 }
   0xb   :  { %1178 = shalt.err (!%p1175_p4)
}
   0xc   :  { %s1246_s21 = smov 64   ;;  %s1247_s22 = smov 4  }
   0xd   :  { %34 = dma.hbm_to_vmem [thread:$0]  %s1302_s1, 8192, %s29_s19, [#allocation6], %s1246_s21, %s1246_s21, %s1247_s22  }
   0xe   :  { %s1248_s25 = smov [#allocation2]   ;;  %s1249_s27 = smov [#allocation7]  }
   0xf   :  { %s19_s26 = sshll.u32 %s1248_s25, 4  ;;  %s42_s28 = sshll.u32 %s1249_s27, 4  ;;  %s20_s26 = int_to_ptr.vmem [resolvable:$true] %s19_s26  ;;  %s43_s28 = int_to_ptr.vmem [resolvable:$true] %s42_s28 }
  0x10   :  { %s1187_s29 = scalar_lea.vmem %s20_s26, 1024  ;;  %p1192_p6 = scmp.lt.s32.totalorder %s20_s26, %s20_s26 }
  0x11   :  { %p1188_p5 = scmp.ne.s32.totalorder %s20_s26, %s1187_s29  ;;  %p1193_p7 = scmp.lt.s32.totalorder %s1187_s29, %s1187_s29 }
  0x13   :  { %p1194_p8 = por %p1193_p7, %p1192_p6 }
  0x15   :  { %p1195_p9 = pnand %p1194_p8, %p1188_p5 }
  0x17   :  { %1198 = shalt.err (!%p1195_p9)
}
  0x18   :  { %22 = dma.hbm_to_vmem [thread:$0]  %s1301_s0, 1024, %s20_s26, [#allocation3]  }
  0x19   :  { %s1207_s7 = scalar_lea.vmem %s43_s28, 1024  ;;  %p1212_p11 = scmp.lt.s32.totalorder %s43_s28, %s43_s28 }
  0x1a   :  { %p1208_p10 = scmp.ne.s32.totalorder %s43_s28, %s1207_s7  ;;  %p1213_p12 = scmp.lt.s32.totalorder %s1207_s7, %s1207_s7 }
  0x1c   :  { %p1214_p13 = por %p1213_p12, %p1212_p11 }
  0x1e   :  { %p1215_p0 = pnand %p1214_p13, %p1208_p10 }
  0x20   :  { %1218 = shalt.err (!%p1215_p0)
}
  0x21   :  { %48 = dma.hbm_to_vmem [thread:$0]  %s1304_s3, 1024, %s43_s28, [#allocation6], %s1246_s21, %s1246_s21, %s1247_s22  }
  0x22   :  { %1239 = dma.done.wait [#allocation3], 1024  }
  0x23   :  { %1240 = vsyncadd [#allocation3], 4294966272 }
  0x24   :  { %1241 = dma.done.wait [#allocation6], 9216  }
  0x25   :  { %1242 = vsyncadd [#allocation6], 4294958080  ;;  %v1085_v0 = vld [vmem:[#allocation5 + $0x78] sm:$0xff]   ;;  %v1089_v4 = vld [vmem:[#allocation5 + $0x70] sm:$0xff]   ;;  %vm1251_vm0 = vmmov 0   ;;  %s1252_s10 = smov [#allocation8]  }
  0x26   :  { %v1086_v1 = vld [vmem:[#allocation5 + $0xf8] sm:$0xff]   ;;  %960 = vmatprep.subr.bf16.mxu0 %v1085_v0  ;;  %v1090_v5 = vld [vmem:[#allocation5 + $0xf0] sm:$0xff]   ;;  %v1093_v8 = vld [vmem:[#allocation5 + $0x68] sm:$0xff]   ;;  %s876_s11 = sshll.u32 %s1252_s10, 4  ;;  %s877_s11 = int_to_ptr.vmem [resolvable:$true] %s876_s11 }
  0x27   :  { %v1087_v2 = vld [vmem:[#allocation5 + $0x38] sm:$0xff]   ;;  %982 = vmatprep.subr.bf16.mxu1 %v1086_v1  ;;  %v1091_v6 = vld [vmem:[#allocation5 + $0x30] sm:$0xff]   ;;  %v1094_v9 = vld [vmem:[#allocation5 + $0xe8] sm:$0xff]   ;;  %s1219_s12 = scalar_lea.vmem %s877_s11, 128  ;;  %p1224_p2 = scmp.lt.s32.totalorder %s877_s11, %s877_s11 }
  0x28   :  { %v1088_v3 = vld [vmem:[#allocation5 + $0xb8] sm:$0xff]   ;;  %961 = vmatpush3.bf16.msra.mxu0 %v1087_v2  ;;  %v1092_v7 = vld [vmem:[#allocation5 + $0xb0] sm:$0xff]   ;;  %v1095_v10 = vld [vmem:[#allocation5 + $0x28] sm:$0xff]   ;;  %p1220_p1 = scmp.ne.s32.totalorder %s877_s11, %s1219_s12  ;;  %p1225_p3 = scmp.lt.s32.totalorder %s1219_s12, %s1219_s12 }
  0x29   :  { %983 = vmatpush3.bf16.msra.mxu1 %v1088_v3  ;;  %962 = vmatprep.subr.bf16.mxu0 %v1089_v4  ;;  %v1096_v11 = vld [vmem:[#allocation5 + $0xa8] sm:$0xff]   ;;  %v1097_v12 = vld [vmem:[#allocation5 + $0x60] sm:$0xff]   ;;  %v1101_v16 = vld [vmem:[#allocation5 + $0x58] sm:$0xff]  }
  0x2a   :  { %984 = vmatprep.subr.bf16.mxu1 %v1090_v5  ;;  %v1098_v13 = vld [vmem:[#allocation5 + $0xe0] sm:$0xff]   ;;  %v1102_v17 = vld [vmem:[#allocation5 + $0xd8] sm:$0xff]   ;;  %v1105_v20 = vld [vmem:[#allocation5 + $0x50] sm:$0xff]   ;;  %p1226_p4 = por %p1225_p3, %p1224_p2 }
  0x2b   :  { %v1099_v14 = vld [vmem:[#allocation5 + $0x20] sm:$0xff]   ;;  %v1103_v18 = vld [vmem:[#allocation5 + $0x18] sm:$0xff]   ;;  %v1106_v21 = vld [vmem:[#allocation5 + $0xd0] sm:$0xff]  }
  0x2c   :  { %963 = vmatpush3.bf16.msra.mxu0 %v1091_v6  ;;  %v1100_v15 = vld [vmem:[#allocation5 + $0xa0] sm:$0xff]   ;;  %v1104_v19 = vld [vmem:[#allocation5 + $0x98] sm:$0xff]   ;;  %v1107_v22 = vld [vmem:[#allocation5 + $0x10] sm:$0xff]   ;;  %p1227_p5 = pnand %p1226_p4, %p1220_p1 }
  0x2d   :  { %985 = vmatpush3.bf16.msra.mxu1 %v1092_v7  ;;  %964 = vmatprep.subr.bf16.mxu0 %v1093_v8  ;;  %v1108_v23 = vld [vmem:[#allocation5 + $0x90] sm:$0xff]   ;;  %v1109_v24 = vld [vmem:[#allocation5 + $0x48] sm:$0xff]   ;;  %v1113_v28 = vld [vmem:[#allocation5 + $0x40] sm:$0xff]  }
  0x2e   :  { %986 = vmatprep.subr.bf16.mxu1 %v1094_v9  ;;  %v1110_v25 = vld [vmem:[#allocation5 + $0xc8] sm:$0xff]   ;;  %v1114_v29 = vld [vmem:[#allocation5 + $0xc0] sm:$0xff]   ;;  %v64_v33 = vld [vmem:[#allocation2 + $0x18] sm:$0xff] }
  0x2f   :  { %v1111_v26 = vld [vmem:[#allocation5 + $0x8] sm:$0xff]   ;;  %v1115_v30 = vld [vmem:[#allocation5] sm:$0xff]   ;;  %v72_v36 = vpack.c.bf16 %v64_v33, %v64_v33  ;;  %v63_v38 = vld [vmem:[#allocation2 + $0x10] sm:$0xff] }
  0x30   :  { %965 = vmatpush3.bf16.msra.mxu0 %v1095_v10  ;;  %v1112_v27 = vld [vmem:[#allocation5 + $0x88] sm:$0xff]   ;;  %v1116_v31 = vld [vmem:[#allocation5 + $0x80] sm:$0xff]   ;;  %v71_v39 = vpack.c.bf16 %v63_v38, %v63_v38  ;;  %v1117_v40 = vld [vmem:[#allocation5 + $0x178] sm:$0xff]  }
  0x31   :  { %987 = vmatpush3.bf16.msra.mxu1 %v1096_v11  ;;  %966 = vmatprep.subr.bf16.mxu0 %v1097_v12  ;;  %v62_v32 = vld [vmem:[#allocation2 + $0x8] sm:$0xff]  ;;  %v61_v34 = vld [vmem:[#allocation2] sm:$0xff]  ;;  %v1118_v41 = vld [vmem:[#allocation5 + $0x1f8] sm:$0xff]  }
  0x32   :  { %988 = vmatprep.subr.bf16.mxu1 %v1098_v13  ;;  %v70_v35 = vpack.c.bf16 %v62_v32, %v62_v32  ;;  %v69_v37 = vpack.c.bf16 %v61_v34, %v61_v34  ;;  %668 = vmatprep.mubr.bf16.mxu1 %v72_v36  ;;  %v1119_v42 = vld [vmem:[#allocation5 + $0x138] sm:$0xff]   ;;  %v1121_v44 = vld [vmem:[#allocation5 + $0x170] sm:$0xff]   ;;  %v1125_v48 = vld [vmem:[#allocation5 + $0x168] sm:$0xff]  }
  0x33   :  { %v1120_v43 = vld [vmem:[#allocation5 + $0x1b8] sm:$0xff]   ;;  %v1122_v45 = vld [vmem:[#allocation5 + $0x1f0] sm:$0xff]   ;;  %v1126_v49 = vld [vmem:[#allocation5 + $0x1e8] sm:$0xff]  }
  0x34   :  { %967 = vmatpush3.bf16.msra.mxu0 %v1099_v14  ;;  %628 = vmatprep.mubr.bf16.mxu0 %v70_v35  ;;  %v1123_v46 = vld [vmem:[#allocation5 + $0x130] sm:$0xff]   ;;  %v1127_v50 = vld [vmem:[#allocation5 + $0x128] sm:$0xff]   ;;  %v1129_v52 = vld [vmem:[#allocation5 + $0x160] sm:$0xff]  }
  0x35   :  { %989 = vmatpush3.bf16.msra.mxu1 %v1100_v15  ;;  %968 = vmatprep.subr.bf16.mxu0 %v1101_v16  ;;  %v1124_v47 = vld [vmem:[#allocation5 + $0x1b0] sm:$0xff]   ;;  %v1128_v51 = vld [vmem:[#allocation5 + $0x1a8] sm:$0xff]   ;;  %v1130_v53 = vld [vmem:[#allocation5 + $0x1e0] sm:$0xff]  }
  0x36   :  { %990 = vmatprep.subr.bf16.mxu1 %v1102_v17  ;;  %v1131_v54 = vld [vmem:[#allocation5 + $0x120] sm:$0xff]   ;;  %v1133_v56 = vld [vmem:[#allocation5 + $0x158] sm:$0xff]   ;;  %v1137_v60 = vld [vmem:[#allocation5 + $0x150] sm:$0xff]   ;;  %v1250_v17 = vmov 0.0  }
  0x37   :  { %v1132_v55 = vld [vmem:[#allocation5 + $0x1a0] sm:$0xff]   ;;  %v1134_v57 = vld [vmem:[#allocation5 + $0x1d8] sm:$0xff]   ;;  %v1138_v61 = vld [vmem:[#allocation5 + $0x1d0] sm:$0xff]  }
  0x38   :  { %969 = vmatpush3.bf16.msra.mxu0 %v1103_v18  ;;  %v1135_v58 = vld [vmem:[#allocation5 + $0x118] sm:$0xff]   ;;  %v1139_v62 = vld [vmem:[#allocation5 + $0x110] sm:$0xff]   ;;  %v1141_v0 = vld [vmem:[#allocation5 + $0x148] sm:$0xff]  }
  0x39   :  { %991 = vmatpush3.bf16.msra.mxu1 %v1104_v19  ;;  %970 = vmatprep.subr.bf16.mxu0 %v1105_v20  ;;  %v1136_v59 = vld [vmem:[#allocation5 + $0x198] sm:$0xff]   ;;  %v1140_v63 = vld [vmem:[#allocation5 + $0x190] sm:$0xff]   ;;  %v1142_v1 = vld [vmem:[#allocation5 + $0x1c8] sm:$0xff]  }
  0x3a   :  { %992 = vmatprep.subr.bf16.mxu1 %v1106_v21  ;;  %v1143_v2 = vld [vmem:[#allocation5 + $0x108] sm:$0xff]   ;;  %v1145_v4 = vld [vmem:[#allocation5 + $0x140] sm:$0xff]   ;;  %v68_v9 = vld [vmem:[#allocation2 + $0x38] sm:$0xff] }
  0x3b   :  { %v1144_v3 = vld [vmem:[#allocation5 + $0x188] sm:$0xff]   ;;  %v1146_v5 = vld [vmem:[#allocation5 + $0x1c0] sm:$0xff]   ;;  %v76_v11 = vpack.c.bf16 %v68_v9, %v68_v9  ;;  %v67_v13 = vld [vmem:[#allocation2 + $0x30] sm:$0xff] }
  0x3c   :  { %971 = vmatpush3.bf16.msra.mxu0 %v1107_v22  ;;  %v1147_v6 = vld [vmem:[#allocation5 + $0x100] sm:$0xff]   ;;  %v66_v8 = vld [vmem:[#allocation2 + $0x28] sm:$0xff]  ;;  %v75_v15 = vpack.c.bf16 %v67_v13, %v67_v13  ;;  %v1149_v16 = vld [vmem:[#allocation7 + $0x38] sm:$0xff]  }
  0x3d   :  { %993 = vmatpush3.bf16.msra.mxu1 %v1108_v23  ;;  %972 = vmatprep.subr.bf16.mxu0 %v1109_v24  ;;  %v1148_v7 = vld [vmem:[#allocation5 + $0x180] sm:$0xff]   ;;  %v74_v10 = vpack.c.bf16 %v66_v8, %v66_v8  ;;  %v1150_v18 = vld [vmem:[#allocation7 + $0x30] sm:$0xff]   ;;  %v1151_v19 = vld [vmem:[#allocation7 + $0x28] sm:$0xff]  }
  0x3e   :  { %994 = vmatprep.subr.bf16.mxu1 %v1110_v25  ;;  %v65_v12 = vld [vmem:[#allocation2 + $0x20] sm:$0xff]  ;;  %v1153_v21 = vld [vmem:[#allocation7 + $0x18] sm:$0xff]   ;;  %v1154_v22 = vld [vmem:[#allocation7 + $0x10] sm:$0xff]  }
  0x3f   :  { %v73_v14 = vpack.c.bf16 %v65_v12, %v65_v12  ;;  %v1152_v20 = vld [vmem:[#allocation7 + $0x20] sm:$0xff]   ;;  %v1155_v23 = vld [vmem:[#allocation7 + $0x8] sm:$0xff]  }
  0x40   :  { %973 = vmatpush3.bf16.msra.mxu0 %v1111_v26  ;;  %v1156_v24 = vld [vmem:[#allocation7] sm:$0xff]  }
  0x41   :  { %995 = vmatpush3.bf16.msra.mxu1 %v1112_v27  ;;  %974 = vmatprep.subr.bf16.mxu0 %v1113_v28  ;;  %v886_v34 = vld [vmem:[%s1303_s2] ss:$0 sm:$0xff] }
  0x42   :  { %996 = vmatprep.subr.bf16.mxu1 %v1114_v29 }
  0x44   :  { %975 = vmatpush3.bf16.msra.mxu0 %v1115_v30 }
  0x45   :  { %997 = vmatpush3.bf16.msra.mxu1 %v1116_v31  ;;  %1004 = vmatprep.subr.bf16.mxu0 %v1117_v40 }
  0x46   :  { %1026 = vmatprep.subr.bf16.mxu1 %v1118_v41 }
  0x47   :  { %629 = vmatmul.mubr.bf16.vlgmr.msra.gmra.mxu0 %v69_v37 }
  0x48   :  { %669 = vmatmul.mubr.bf16.vlgmr.msra.gmra.mxu1 %v71_v39  ;;  %1005 = vmatpush3.bf16.msra.mxu0 %v1119_v42 }
  0x49   :  { %1027 = vmatpush3.bf16.msra.mxu1 %v1120_v43  ;;  %1006 = vmatprep.subr.bf16.mxu0 %v1121_v44 }
  0x4a   :  { %1028 = vmatprep.subr.bf16.mxu1 %v1122_v45  ;;  %708 = vmatprep.mubr.bf16.mxu0 %v74_v10 }
  0x4b   :  { %748 = vmatprep.mubr.bf16.mxu1 %v76_v11 }
  0x4c   :  { %1007 = vmatpush3.bf16.msra.mxu0 %v1123_v46 }
  0x4d   :  { %1029 = vmatpush3.bf16.msra.mxu1 %v1124_v47  ;;  %1008 = vmatprep.subr.bf16.mxu0 %v1125_v48 }
  0x4e   :  { %1030 = vmatprep.subr.bf16.mxu1 %v1126_v49 }
  0x50   :  { %1009 = vmatpush3.bf16.msra.mxu0 %v1127_v50 }
  0x51   :  { %1031 = vmatpush3.bf16.msra.mxu1 %v1128_v51  ;;  %1010 = vmatprep.subr.bf16.mxu0 %v1129_v52  ;;  %v951_v52 = vld [vmem:[%s1305_s4] ss:$0 sm:$0xff] }
  0x52   :  { %1032 = vmatprep.subr.bf16.mxu1 %v1130_v53 }
  0x54   :  { %1011 = vmatpush3.bf16.msra.mxu0 %v1131_v54 }
  0x55   :  { %1033 = vmatpush3.bf16.msra.mxu1 %v1132_v55  ;;  %1012 = vmatprep.subr.bf16.mxu0 %v1133_v56 }
  0x56   :  { %1034 = vmatprep.subr.bf16.mxu1 %v1134_v57 }
  0x58   :  { %1013 = vmatpush3.bf16.msra.mxu0 %v1135_v58 }
  0x59   :  { %1035 = vmatpush3.bf16.msra.mxu1 %v1136_v59  ;;  %1014 = vmatprep.subr.bf16.mxu0 %v1137_v60 }
  0x5a   :  { %1036 = vmatprep.subr.bf16.mxu1 %v1138_v61 }
  0x5c   :  { %1015 = vmatpush3.bf16.msra.mxu0 %v1139_v62 }
  0x5d   :  { %1037 = vmatpush3.bf16.msra.mxu1 %v1140_v63  ;;  %1016 = vmatprep.subr.bf16.mxu0 %v1141_v0 }
  0x5e   :  { %1038 = vmatprep.subr.bf16.mxu1 %v1142_v1 }
  0x60   :  { %1017 = vmatpush3.bf16.msra.mxu0 %v1143_v2 }
  0x61   :  { %1039 = vmatpush3.bf16.msra.mxu1 %v1144_v3  ;;  %1018 = vmatprep.subr.bf16.mxu0 %v1145_v4 }
  0x62   :  { %1040 = vmatprep.subr.bf16.mxu1 %v1146_v5 }
  0x64   :  { %1019 = vmatpush3.bf16.msra.mxu0 %v1147_v6 }
  0x65   :  { %1041 = vmatpush3.bf16.msra.mxu1 %v1148_v7  ;;  %1057 = vmatprep.subr.bf16.mxu0 %v1250_v17 }
  0x67   :  { %709 = vmatmul.mubr.bf16.vlgmr.msra.gmra.mxu0 %v73_v14 }
  0x68   :  { %749 = vmatmul.mubr.bf16.vlgmr.msra.gmra.mxu1 %v75_v15  ;;  %1058 = vmatpush3.bf16.msra.mxu0 %v1149_v16 }
  0x69   :  { %1059 = vmatprep.subr.bf16.mxu0 %v1250_v17  ;;  %1073 = vmatprep.mubr.msk.bf16.mxu0 %vm1251_vm0, %v1250_v17 }
  0x6c   :  { %1060 = vmatpush3.bf16.msra.mxu0 %v1150_v18 }
  0x6d   :  { %1061 = vmatprep.subr.bf16.mxu0 %v1250_v17 }
  0x70   :  { %1062 = vmatpush3.bf16.msra.mxu0 %v1151_v19 }
  0x71   :  { %1063 = vmatprep.subr.bf16.mxu0 %v1250_v17 }
  0x74   :  { %1064 = vmatpush3.bf16.msra.mxu0 %v1152_v20 }
  0x75   :  { %1065 = vmatprep.subr.bf16.mxu0 %v1250_v17 }
  0x78   :  { %1066 = vmatpush3.bf16.msra.mxu0 %v1153_v21 }
  0x79   :  { %1067 = vmatprep.subr.bf16.mxu0 %v1250_v17 }
  0x7c   :  { %1068 = vmatpush3.bf16.msra.mxu0 %v1154_v22 }
  0x7d   :  { %1069 = vmatprep.subr.bf16.mxu0 %v1250_v17 }
  0x80   :  { %1070 = vmatpush3.bf16.msra.mxu0 %v1155_v23 }
  0x81   :  { %1071 = vmatprep.subr.bf16.mxu0 %v1250_v17 }
  0x84   :  { %1072 = vmatpush3.bf16.msra.mxu0 %v1156_v24 }
 0x107   :  { %v976_v25 = vpop.f32.mrf.mxu0 }
 0x108   :  { %v998_v26 = vpop.f32.mrf.mxu1 }
 0x109   :  { %v977_v27 = vpop.f32.mrf.mxu0 }
 0x10a   :  { %v999_v28 = vpop.f32.mrf.mxu1  ;;  %v978_v33 = vadd.f32 %v977_v27, %v976_v25 }
 0x10b   :  { %v979_v29 = vpop.f32.mrf.mxu0  ;;  %v1000_v36 = vadd.f32 %v999_v28, %v998_v26 }
 0x10c   :  { %v1001_v30 = vpop.f32.mrf.mxu1  ;;  %v631_v35 = vadd.f32 %v978_v33, %v886_v34 }
 0x10d   :  { %v980_v31 = vpop.f32.mrf.mxu0 }
 0x10e   :  { %v1002_v32 = vpop.f32.mrf.mxu1  ;;  %v671_v40 = vadd.f32 %v1000_v36, %v631_v35 }
 0x127   :  { %v1020_v37 = vpop.f32.mrf.mxu0 }
 0x128   :  { %v1042_v38 = vpop.f32.mrf.mxu1 }
 0x129   :  { %v1021_v39 = vpop.f32.mrf.mxu0 }
 0x12a   :  { %v1022_v41 = vadd.f32 %v1021_v39, %v1020_v37  ;;  %v1043_v42 = vpop.f32.mrf.mxu1 }
 0x12b   :  { %v1023_v43 = vpop.f32.mrf.mxu0  ;;  %v1044_v45 = vadd.f32 %v1043_v42, %v1042_v38 }
 0x12c   :  { %v711_v44 = vadd.f32 %v1022_v41, %v671_v40  ;;  %v1045_v46 = vpop.f32.mrf.mxu1 }
 0x12d   :  { %v1024_v47 = vpop.f32.mrf.mxu0 }
 0x12e   :  { %v751_v48 = vadd.f32 %v1044_v45, %v711_v44  ;;  %v1046_v49 = vpop.f32.mrf.mxu1 }
 0x130   :  { %1157 = vtanh.f32 %v751_v48 }
 0x13d   :  { %v1158_v50 = vpop.eup %1157 }
 0x13e   :  { %v757_v51 = vpack.c.bf16 %v1158_v50, %v1158_v50 }
 0x140   :  { %1074 = vmatmul.mubr.bf16.vlgmr.msra.gmra.mxu0 %v757_v51 }
 0x200   :  { %v863_v53 = vpop.f32.mrf.mxu0 }
 0x201   :  { %v864_v54 = vadd.f32 %v951_v52, %v863_v53 }
 0x202   :  { %v1075_v55 = vpop.f32.mrf.mxu0 }
 0x203   :  { %869 = vst [vmem:[#allocation8] sm:$0xff] %v864_v54 }
 0x204   :  { %v866_v56 = vpop.f32.mrf.mxu0 }
 0x205   :  { %1230 = shalt.err (!%p1227_p5)
}
 0x206   :  { %879 = dma.vmem_to_hbm [thread:$0]  %s877_s11, 128, %s1306_s5, [#allocation4]   ;;  %v1076_v57 = vpop.f32.mrf.mxu0 }
 0x207   :  { %1243 = dma.done.wait [#allocation4], 128  }
 0x208   :  { %1244 = vsyncadd [#allocation4], 4294967168 }
 0x209   :  { %883 = vsyncpa [#allocation3], 1 }
 0x20a   :  { %884 = vsyncpa [#allocation6], 1 }
 0x20b   :  { %885 = vsyncpa [#allocation4], 1 }

// kernel: tpu_custom_call.1
= control target key start
LH: loop header
LB: loop body
LE: loop exit
PB: predicated region body
PF: predicated region fallthrough
CT: control target
= control target key end

     0   :  { %10 = vsyncpa [#allocation3], 0  ;;  %s1301_s0 = inlined_call_operand.hbm [shape: f32[8,1024], index: 0, kind: input, shape index: {}]   ;;  %s1302_s1 = inlined_call_operand.hbm [shape: bf16[1024,128], index: 1, kind: input, shape index: {}]   ;;  %s1303_s2 = inlined_call_operand.vmem [shape: f32[1,128], index: 2, kind: input, shape index: {}]   ;;  %s1304_s3 = inlined_call_operand.hbm [shape: bf16[128,128], index: 3, kind: input, shape index: {}]   ;;  %s1305_s4 = inlined_call_operand.vmem [shape: f32[1,128], index: 4, kind: input, shape index: {}]   ;;  %s1306_s5 = inlined_call_operand.hbm [shape: f32[8,128], index: 5, kind: output, shape index: {}]  }
   0x1   :  { %11 = vsyncpa [#allocation6], 0 }
   0x2   :  { %12 = vsyncpa [#allocation4], 0  ;;  %s1245_s18 = smov [#allocation5]  }
   0x3   :  { %s28_s19 = sshll.u32 %s1245_s18, 4  ;;  %s29_s19 = int_to_ptr.vmem [resolvable:$true] %s28_s19 }
   0x4   :  { %s1167_s20 = scalar_lea.vmem %s29_s19, 8192  ;;  %p1172_p1 = scmp.lt.s32.totalorder %s29_s19, %s29_s19 }
   0x5   :  { %p1168_p0 = scmp.ne.s32.totalorder %s29_s19, %s1167_s20  ;;  %p1173_p2 = scmp.lt.s32.totalorder %s1167_s20, %s1167_s20 }
   0x7   :  { %p1174_p3 = por %p1173_p2, %p1172_p1 }
   0x9   :  { %p1175_p4 = pnand %p1174_p3, %p1168_p0 }
   0xb   :  { %1178 = shalt.err (!%p1175_p4)
}
   0xc   :  { %s1246_s21 = smov 64   ;;  %s1247_s22 = smov 4  }
   0xd   :  { %34 = dma.hbm_to_vmem [thread:$0]  %s1302_s1, 8192, %s29_s19, [#allocation6], %s1246_s21, %s1246_s21, %s1247_s22  }
   0xe   :  { %s1248_s25 = smov [#allocation2]   ;;  %s1249_s27 = smov [#allocation7]  }
   0xf   :  { %s19_s26 = sshll.u32 %s1248_s25, 4  ;;  %s42_s28 = sshll.u32 %s1249_s27, 4  ;;  %s20_s26 = int_to_ptr.vmem [resolvable:$true] %s19_s26  ;;  %s43_s28 = int_to_ptr.vmem [resolvable:$true] %s42_s28 }
  0x10   :  { %s1187_s29 = scalar_lea.vmem %s20_s26, 1024  ;;  %p1192_p6 = scmp.lt.s32.totalorder %s20_s26, %s20_s26 }
  0x11   :  { %p1188_p5 = scmp.ne.s32.totalorder %s20_s26, %s1187_s29  ;;  %p1193_p7 = scmp.lt.s32.totalorder %s1187_s29, %s1187_s29 }
  0x13   :  { %p1194_p8 = por %p1193_p7, %p1192_p6 }
  0x15   :  { %p1195_p9 = pnand %p1194_p8, %p1188_p5 }
  0x17   :  { %1198 = shalt.err (!%p1195_p9)
}
  0x18   :  { %22 = dma.hbm_to_vmem [thread:$0]  %s1301_s0, 1024, %s20_s26, [#allocation3]  }
  0x19   :  { %s1207_s7 = scalar_lea.vmem %s43_s28, 1024  ;;  %p1212_p11 = scmp.lt.s32.totalorder %s43_s28, %s43_s28 }
  0x1a   :  { %p1208_p10 = scmp.ne.s32.totalorder %s43_s28, %s1207_s7  ;;  %p1213_p12 = scmp.lt.s32.totalorder %s1207_s7, %s1207_s7 }
  0x1c   :  { %p1214_p13 = por %p1213_p12, %p1212_p11 }
  0x1e   :  { %p1215_p0 = pnand %p1214_p13, %p1208_p10 }
  0x20   :  { %1218 = shalt.err (!%p1215_p0)
}
  0x21   :  { %48 = dma.hbm_to_vmem [thread:$0]  %s1304_s3, 1024, %s43_s28, [#allocation6], %s1246_s21, %s1246_s21, %s1247_s22  }
  0x22   :  { %1239 = dma.done.wait [#allocation3], 1024  }
  0x23   :  { %1240 = vsyncadd [#allocation3], 4294966272 }
  0x24   :  { %1241 = dma.done.wait [#allocation6], 9216  }
  0x25   :  { %1242 = vsyncadd [#allocation6], 4294958080  ;;  %v1085_v0 = vld [vmem:[#allocation5 + $0x78] sm:$0xff]   ;;  %v1089_v4 = vld [vmem:[#allocation5 + $0x70] sm:$0xff]   ;;  %vm1251_vm0 = vmmov 0   ;;  %s1252_s10 = smov [#allocation8]  }
  0x26   :  { %v1086_v1 = vld [vmem:[#allocation5 + $0xf8] sm:$0xff]   ;;  %960 = vmatprep.subr.bf16.mxu0 %v1085_v0  ;;  %v1090_v5 = vld [vmem:[#allocation5 + $0xf0] sm:$0xff]   ;;  %v1093_v8 = vld [vmem:[#allocation5 + $0x68] sm:$0xff]   ;;  %s876_s11 = sshll.u32 %s1252_s10, 4  ;;  %s877_s11 = int_to_ptr.vmem [resolvable:$true] %s876_s11 }
  0x27   :  { %v1087_v2 = vld [vmem:[#allocation5 + $0x38] sm:$0xff]   ;;  %982 = vmatprep.subr.bf16.mxu1 %v1086_v1  ;;  %v1091_v6 = vld [vmem:[#allocation5 + $0x30] sm:$0xff]   ;;  %v1094_v9 = vld [vmem:[#allocation5 + $0xe8] sm:$0xff]   ;;  %s1219_s12 = scalar_lea.vmem %s877_s11, 128  ;;  %p1224_p2 = scmp.lt.s32.totalorder %s877_s11, %s877_s11 }
  0x28   :  { %v1088_v3 = vld [vmem:[#allocation5 + $0xb8] sm:$0xff]   ;;  %961 = vmatpush3.bf16.msra.mxu0 %v1087_v2  ;;  %v1092_v7 = vld [vmem:[#allocation5 + $0xb0] sm:$0xff]   ;;  %v1095_v10 = vld [vmem:[#allocation5 + $0x28] sm:$0xff]   ;;  %p1220_p1 = scmp.ne.s32.totalorder %s877_s11, %s1219_s12  ;;  %p1225_p3 = scmp.lt.s32.totalorder %s1219_s12, %s1219_s12 }
  0x29   :  { %983 = vmatpush3.bf16.msra.mxu1 %v1088_v3  ;;  %962 = vmatprep.subr.bf16.mxu0 %v1089_v4  ;;  %v1096_v11 = vld [vmem:[#allocation5 + $0xa8] sm:$0xff]   ;;  %v1097_v12 = vld [vmem:[#allocation5 + $0x60] sm:$0xff]   ;;  %v1101_v16 = vld [vmem:[#allocation5 + $0x58] sm:$0xff]  }
  0x2a   :  { %984 = vmatprep.subr.bf16.mxu1 %v1090_v5  ;;  %v1098_v13 = vld [vmem:[#allocation5 + $0xe0] sm:$0xff]   ;;  %v1102_v17 = vld [vmem:[#allocation5 + $0xd8] sm:$0xff]   ;;  %v1105_v20 = vld [vmem:[#allocation5 + $0x50] sm:$0xff]   ;;  %p1226_p4 = por %p1225_p3, %p1224_p2 }
  0x2b   :  { %v1099_v14 = vld [vmem:[#allocation5 + $0x20] sm:$0xff]   ;;  %v1103_v18 = vld [vmem:[#allocation5 + $0x18] sm:$0xff]   ;;  %v1106_v21 = vld [vmem:[#allocation5 + $0xd0] sm:$0xff]  }
  0x2c   :  { %963 = vmatpush3.bf16.msra.mxu0 %v1091_v6  ;;  %v1100_v15 = vld [vmem:[#allocation5 + $0xa0] sm:$0xff]   ;;  %v1104_v19 = vld [vmem:[#allocation5 + $0x98] sm:$0xff]   ;;  %v1107_v22 = vld [vmem:[#allocation5 + $0x10] sm:$0xff]   ;;  %p1227_p5 = pnand %p1226_p4, %p1220_p1 }
  0x2d   :  { %985 = vmatpush3.bf16.msra.mxu1 %v1092_v7  ;;  %964 = vmatprep.subr.bf16.mxu0 %v1093_v8  ;;  %v1108_v23 = vld [vmem:[#allocation5 + $0x90] sm:$0xff]   ;;  %v1109_v24 = vld [vmem:[#allocation5 + $0x48] sm:$0xff]   ;;  %v1113_v28 = vld [vmem:[#allocation5 + $0x40] sm:$0xff]  }
  0x2e   :  { %986 = vmatprep.subr.bf16.mxu1 %v1094_v9  ;;  %v1110_v25 = vld [vmem:[#allocation5 + $0xc8] sm:$0xff]   ;;  %v1114_v29 = vld [vmem:[#allocation5 + $0xc0] sm:$0xff]   ;;  %v64_v33 = vld [vmem:[#allocation2 + $0x18] sm:$0xff] }
  0x2f   :  { %v1111_v26 = vld [vmem:[#allocation5 + $0x8] sm:$0xff]   ;;  %v1115_v30 = vld [vmem:[#allocation5] sm:$0xff]   ;;  %v72_v36 = vpack.c.bf16 %v64_v33, %v64_v33  ;;  %v63_v38 = vld [vmem:[#allocation2 + $0x10] sm:$0xff] }
  0x30   :  { %965 = vmatpush3.bf16.msra.mxu0 %v1095_v10  ;;  %v1112_v27 = vld [vmem:[#allocation5 + $0x88] sm:$0xff]   ;;  %v1116_v31 = vld [vmem:[#allocation5 + $0x80] sm:$0xff]   ;;  %v71_v39 = vpack.c.bf16 %v63_v38, %v63_v38  ;;  %v1117_v40 = vld [vmem:[#allocation5 + $0x178] sm:$0xff]  }
  0x31   :  { %987 = vmatpush3.bf16.msra.mxu1 %v1096_v11  ;;  %966 = vmatprep.subr.bf16.mxu0 %v1097_v12  ;;  %v62_v32 = vld [vmem:[#allocation2 + $0x8] sm:$0xff]  ;;  %v61_v34 = vld [vmem:[#allocation2] sm:$0xff]  ;;  %v1118_v41 = vld [vmem:[#allocation5 + $0x1f8] sm:$0xff]  }
  0x32   :  { %988 = vmatprep.subr.bf16.mxu1 %v1098_v13  ;;  %v70_v35 = vpack.c.bf16 %v62_v32, %v62_v32  ;;  %v69_v37 = vpack.c.bf16 %v61_v34, %v61_v34  ;;  %668 = vmatprep.mubr.bf16.mxu1 %v72_v36  ;;  %v1119_v42 = vld [vmem:[#allocation5 + $0x138] sm:$0xff]   ;;  %v1121_v44 = vld [vmem:[#allocation5 + $0x170] sm:$0xff]   ;;  %v1125_v48 = vld [vmem:[#allocation5 + $0x168] sm:$0xff]  }
  0x33   :  { %v1120_v43 = vld [vmem:[#allocation5 + $0x1b8] sm:$0xff]   ;;  %v1122_v45 = vld [vmem:[#allocation5 + $0x1f0] sm:$0xff]   ;;  %v1126_v49 = vld [vmem:[#allocation5 + $0x1e8] sm:$0xff]  }
  0x34   :  { %967 = vmatpush3.bf16.msra.mxu0 %v1099_v14  ;;  %628 = vmatprep.mubr.bf16.mxu0 %v70_v35  ;;  %v1123_v46 = vld [vmem:[#allocation5 + $0x130] sm:$0xff]   ;;  %v1127_v50 = vld [vmem:[#allocation5 + $0x128] sm:$0xff]   ;;  %v1129_v52 = vld [vmem:[#allocation5 + $0x160] sm:$0xff]  }
  0x35   :  { %989 = vmatpush3.bf16.msra.mxu1 %v1100_v15  ;;  %968 = vmatprep.subr.bf16.mxu0 %v1101_v16  ;;  %v1124_v47 = vld [vmem:[#allocation5 + $0x1b0] sm:$0xff]   ;;  %v1128_v51 = vld [vmem:[#allocation5 + $0x1a8] sm:$0xff]   ;;  %v1130_v53 = vld [vmem:[#allocation5 + $0x1e0] sm:$0xff]  }
  0x36   :  { %990 = vmatprep.subr.bf16.mxu1 %v1102_v17  ;;  %v1131_v54 = vld [vmem:[#allocation5 + $0x120] sm:$0xff]   ;;  %v1133_v56 = vld [vmem:[#allocation5 + $0x158] sm:$0xff]   ;;  %v1137_v60 = vld [vmem:[#allocation5 + $0x150] sm:$0xff]   ;;  %v1250_v17 = vmov 0.0  }
  0x37   :  { %v1132_v55 = vld [vmem:[#allocation5 + $0x1a0] sm:$0xff]   ;;  %v1134_v57 = vld [vmem:[#allocation5 + $0x1d8] sm:$0xff]   ;;  %v1138_v61 = vld [vmem:[#allocation5 + $0x1d0] sm:$0xff]  }
  0x38   :  { %969 = vmatpush3.bf16.msra.mxu0 %v1103_v18  ;;  %v1135_v58 = vld [vmem:[#allocation5 + $0x118] sm:$0xff]   ;;  %v1139_v62 = vld [vmem:[#allocation5 + $0x110] sm:$0xff]   ;;  %v1141_v0 = vld [vmem:[#allocation5 + $0x148] sm:$0xff]  }
  0x39   :  { %991 = vmatpush3.bf16.msra.mxu1 %v1104_v19  ;;  %970 = vmatprep.subr.bf16.mxu0 %v1105_v20  ;;  %v1136_v59 = vld [vmem:[#allocation5 + $0x198] sm:$0xff]   ;;  %v1140_v63 = vld [vmem:[#allocation5 + $0x190] sm:$0xff]   ;;  %v1142_v1 = vld [vmem:[#allocation5 + $0x1c8] sm:$0xff]  }
  0x3a   :  { %992 = vmatprep.subr.bf16.mxu1 %v1106_v21  ;;  %v1143_v2 = vld [vmem:[#allocation5 + $0x108] sm:$0xff]   ;;  %v1145_v4 = vld [vmem:[#allocation5 + $0x140] sm:$0xff]   ;;  %v68_v9 = vld [vmem:[#allocation2 + $0x38] sm:$0xff] }
  0x3b   :  { %v1144_v3 = vld [vmem:[#allocation5 + $0x188] sm:$0xff]   ;;  %v1146_v5 = vld [vmem:[#allocation5 + $0x1c0] sm:$0xff]   ;;  %v76_v11 = vpack.c.bf16 %v68_v9, %v68_v9  ;;  %v67_v13 = vld [vmem:[#allocation2 + $0x30] sm:$0xff] }
  0x3c   :  { %971 = vmatpush3.bf16.msra.mxu0 %v1107_v22  ;;  %v1147_v6 = vld [vmem:[#allocation5 + $0x100] sm:$0xff]   ;;  %v66_v8 = vld [vmem:[#allocation2 + $0x28] sm:$0xff]  ;;  %v75_v15 = vpack.c.bf16 %v67_v13, %v67_v13  ;;  %v1149_v16 = vld [vmem:[#allocation7 + $0x38] sm:$0xff]  }
  0x3d   :  { %993 = vmatpush3.bf16.msra.mxu1 %v1108_v23  ;;  %972 = vmatprep.subr.bf16.mxu0 %v1109_v24  ;;  %v1148_v7 = vld [vmem:[#allocation5 + $0x180] sm:$0xff]   ;;  %v74_v10 = vpack.c.bf16 %v66_v8, %v66_v8  ;;  %v1150_v18 = vld [vmem:[#allocation7 + $0x30] sm:$0xff]   ;;  %v1151_v19 = vld [vmem:[#allocation7 + $0x28] sm:$0xff]  }
  0x3e   :  { %994 = vmatprep.subr.bf16.mxu1 %v1110_v25  ;;  %v65_v12 = vld [vmem:[#allocation2 + $0x20] sm:$0xff]  ;;  %v1153_v21 = vld [vmem:[#allocation7 + $0x18] sm:$0xff]   ;;  %v1154_v22 = vld [vmem:[#allocation7 + $0x10] sm:$0xff]  }
  0x3f   :  { %v73_v14 = vpack.c.bf16 %v65_v12, %v65_v12  ;;  %v1152_v20 = vld [vmem:[#allocation7 + $0x20] sm:$0xff]   ;;  %v1155_v23 = vld [vmem:[#allocation7 + $0x8] sm:$0xff]  }
  0x40   :  { %973 = vmatpush3.bf16.msra.mxu0 %v1111_v26  ;;  %v1156_v24 = vld [vmem:[#allocation7] sm:$0xff]  }
  0x41   :  { %995 = vmatpush3.bf16.msra.mxu1 %v1112_v27  ;;  %974 = vmatprep.subr.bf16.mxu0 %v1113_v28  ;;  %v886_v34 = vld [vmem:[%s1303_s2] ss:$0 sm:$0xff] }
  0x42   :  { %996 = vmatprep.subr.bf16.mxu1 %v1114_v29 }
  0x44   :  { %975 = vmatpush3.bf16.msra.mxu0 %v1115_v30 }
  0x45   :  { %997 = vmatpush3.bf16.msra.mxu1 %v1116_v31  ;;  %1004 = vmatprep.subr.bf16.mxu0 %v1117_v40 }
  0x46   :  { %1026 = vmatprep.subr.bf16.mxu1 %v1118_v41 }
  0x47   :  { %629 = vmatmul.mubr.bf16.vlgmr.msra.gmra.mxu0 %v69_v37 }
  0x48   :  { %669 = vmatmul.mubr.bf16.vlgmr.msra.gmra.mxu1 %v71_v39  ;;  %1005 = vmatpush3.bf16.msra.mxu0 %v1119_v42 }
  0x49   :  { %1027 = vmatpush3.bf16.msra.mxu1 %v1120_v43  ;;  %1006 = vmatprep.subr.bf16.mxu0 %v1121_v44 }
  0x4a   :  { %1028 = vmatprep.subr.bf16.mxu1 %v1122_v45  ;;  %708 = vmatprep.mubr.bf16.mxu0 %v74_v10 }
  0x4b   :  { %748 = vmatprep.mubr.bf16.mxu1 %v76_v11 }
  0x4c   :  { %1007 = vmatpush3.bf16.msra.mxu0 %v1123_v46 }
  0x4d   :  { %1029 = vmatpush3.bf16.msra.mxu1 %v1124_v47  ;;  %1008 = vmatprep.subr.bf16.mxu0 %v1125_v48 }
  0x4e   :  { %1030 = vmatprep.subr.bf16.mxu1 %v1126_v49 }
  0x50   :  { %1009 = vmatpush3.bf16.msra.mxu0 %v1127_v50 }
  0x51   :  { %1031 = vmatpush3.bf16.msra.mxu1 %v1128_v51  ;;  %1010 = vmatprep.subr.bf16.mxu0 %v1129_v52  ;;  %v951_v52 = vld [vmem:[%s1305_s4] ss:$0 sm:$0xff] }
  0x52   :  { %1032 = vmatprep.subr.bf16.mxu1 %v1130_v53 }
  0x54   :  { %1011 = vmatpush3.bf16.msra.mxu0 %v1131_v54 }
  0x55   :  { %1033 = vmatpush3.bf16.msra.mxu1 %v1132_v55  ;;  %1012 = vmatprep.subr.bf16.mxu0 %v1133_v56 }
  0x56   :  { %1034 = vmatprep.subr.bf16.mxu1 %v1134_v57 }
  0x58   :  { %1013 = vmatpush3.bf16.msra.mxu0 %v1135_v58 }
  0x59   :  { %1035 = vmatpush3.bf16.msra.mxu1 %v1136_v59  ;;  %1014 = vmatprep.subr.bf16.mxu0 %v1137_v60 }
  0x5a   :  { %1036 = vmatprep.subr.bf16.mxu1 %v1138_v61 }
  0x5c   :  { %1015 = vmatpush3.bf16.msra.mxu0 %v1139_v62 }
  0x5d   :  { %1037 = vmatpush3.bf16.msra.mxu1 %v1140_v63  ;;  %1016 = vmatprep.subr.bf16.mxu0 %v1141_v0 }
  0x5e   :  { %1038 = vmatprep.subr.bf16.mxu1 %v1142_v1 }
  0x60   :  { %1017 = vmatpush3.bf16.msra.mxu0 %v1143_v2 }
  0x61   :  { %1039 = vmatpush3.bf16.msra.mxu1 %v1144_v3  ;;  %1018 = vmatprep.subr.bf16.mxu0 %v1145_v4 }
  0x62   :  { %1040 = vmatprep.subr.bf16.mxu1 %v1146_v5 }
  0x64   :  { %1019 = vmatpush3.bf16.msra.mxu0 %v1147_v6 }
  0x65   :  { %1041 = vmatpush3.bf16.msra.mxu1 %v1148_v7  ;;  %1057 = vmatprep.subr.bf16.mxu0 %v1250_v17 }
  0x67   :  { %709 = vmatmul.mubr.bf16.vlgmr.msra.gmra.mxu0 %v73_v14 }
  0x68   :  { %749 = vmatmul.mubr.bf16.vlgmr.msra.gmra.mxu1 %v75_v15  ;;  %1058 = vmatpush3.bf16.msra.mxu0 %v1149_v16 }
  0x69   :  { %1059 = vmatprep.subr.bf16.mxu0 %v1250_v17  ;;  %1073 = vmatprep.mubr.msk.bf16.mxu0 %vm1251_vm0, %v1250_v17 }
  0x6c   :  { %1060 = vmatpush3.bf16.msra.mxu0 %v1150_v18 }
  0x6d   :  { %1061 = vmatprep.subr.bf16.mxu0 %v1250_v17 }
  0x70   :  { %1062 = vmatpush3.bf16.msra.mxu0 %v1151_v19 }
  0x71   :  { %1063 = vmatprep.subr.bf16.mxu0 %v1250_v17 }
  0x74   :  { %1064 = vmatpush3.bf16.msra.mxu0 %v1152_v20 }
  0x75   :  { %1065 = vmatprep.subr.bf16.mxu0 %v1250_v17 }
  0x78   :  { %1066 = vmatpush3.bf16.msra.mxu0 %v1153_v21 }
  0x79   :  { %1067 = vmatprep.subr.bf16.mxu0 %v1250_v17 }
  0x7c   :  { %1068 = vmatpush3.bf16.msra.mxu0 %v1154_v22 }
  0x7d   :  { %1069 = vmatprep.subr.bf16.mxu0 %v1250_v17 }
  0x80   :  { %1070 = vmatpush3.bf16.msra.mxu0 %v1155_v23 }
  0x81   :  { %1071 = vmatprep.subr.bf16.mxu0 %v1250_v17 }
  0x84   :  { %1072 = vmatpush3.bf16.msra.mxu0 %v1156_v24 }
 0x107   :  { %v976_v25 = vpop.f32.mrf.mxu0 }
 0x108   :  { %v998_v26 = vpop.f32.mrf.mxu1 }
 0x109   :  { %v977_v27 = vpop.f32.mrf.mxu0 }
 0x10a   :  { %v999_v28 = vpop.f32.mrf.mxu1  ;;  %v978_v33 = vadd.f32 %v977_v27, %v976_v25 }
 0x10b   :  { %v979_v29 = vpop.f32.mrf.mxu0  ;;  %v1000_v36 = vadd.f32 %v999_v28, %v998_v26 }
 0x10c   :  { %v1001_v30 = vpop.f32.mrf.mxu1  ;;  %v631_v35 = vadd.f32 %v978_v33, %v886_v34 }
 0x10d   :  { %v980_v31 = vpop.f32.mrf.mxu0 }
 0x10e   :  { %v1002_v32 = vpop.f32.mrf.mxu1  ;;  %v671_v40 = vadd.f32 %v1000_v36, %v631_v35 }
 0x127   :  { %v1020_v37 = vpop.f32.mrf.mxu0 }
 0x128   :  { %v1042_v38 = vpop.f32.mrf.mxu1 }
 0x129   :  { %v1021_v39 = vpop.f32.mrf.mxu0 }
 0x12a   :  { %v1022_v41 = vadd.f32 %v1021_v39, %v1020_v37  ;;  %v1043_v42 = vpop.f32.mrf.mxu1 }
 0x12b   :  { %v1023_v43 = vpop.f32.mrf.mxu0  ;;  %v1044_v45 = vadd.f32 %v1043_v42, %v1042_v38 }
 0x12c   :  { %v711_v44 = vadd.f32 %v1022_v41, %v671_v40  ;;  %v1045_v46 = vpop.f32.mrf.mxu1 }
 0x12d   :  { %v1024_v47 = vpop.f32.mrf.mxu0 }
 0x12e   :  { %v751_v48 = vadd.f32 %v1044_v45, %v711_v44  ;;  %v1046_v49 = vpop.f32.mrf.mxu1 }
 0x130   :  { %1157 = vtanh.f32 %v751_v48 }
 0x13d   :  { %v1158_v50 = vpop.eup %1157 }
 0x13e   :  { %v757_v51 = vpack.c.bf16 %v1158_v50, %v1158_v50 }
 0x140   :  { %1074 = vmatmul.mubr.bf16.vlgmr.msra.gmra.mxu0 %v757_v51 }
 0x200   :  { %v863_v53 = vpop.f32.mrf.mxu0 }
 0x201   :  { %v864_v54 = vadd.f32 %v951_v52, %v863_v53 }
 0x202   :  { %v1075_v55 = vpop.f32.mrf.mxu0 }
 0x203   :  { %869 = vst [vmem:[#allocation8] sm:$0xff] %v864_v54 }
 0x204   :  { %v866_v56 = vpop.f32.mrf.mxu0 }
 0x205   :  { %1230 = shalt.err (!%p1227_p5)
}
 0x206   :  { %879 = dma.vmem_to_hbm [thread:$0]  %s877_s11, 128, %s1306_s5, [#allocation4]   ;;  %v1076_v57 = vpop.f32.mrf.mxu0 }
 0x207   :  { %1243 = dma.done.wait [#allocation4], 128  }
 0x208   :  { %1244 = vsyncadd [#allocation4], 4294967168 }
 0x209   :  { %883 = vsyncpa [#allocation3], 1 }
 0x20a   :  { %884 = vsyncpa [#allocation6], 1 }
 0x20b   :  { %885 = vsyncpa [#allocation4], 1 }

</bundles_post_ra>
